<compile_context>
chip_gen: v5e
topology: v5e:2x2
jax: 0.10.0
libtpu: 0.0.40
codegen_flags: <defaults>
</compile_context>

<pallas_src>
import functools
import math

import jax
import jax.numpy as jnp
from jax import lax
from jax.experimental import pallas as pl
from jax.experimental.pallas import tpu as pltpu


def _round_up(x, m):
    return (x + m - 1) // m * m


def _cdiv(a, b):
    return (a + b - 1) // b


def _tpu_vmem_bytes():
    """Physical VMEM, if discoverable; conservative (v7x-class) default otherwise."""
    try:
        info = pltpu.get_tpu_info()
        v = int(getattr(info, "vmem_capacity_bytes", 0) or 0)
        if v > 0:
            return v
    except Exception:
        pass
    return 64 << 20


def _pick_row_tile(R):
    """(TR, nrb, row_ragged). Prefers a TR that divides R exactly (no masking)."""
    if R <= 1024:
        return R, 1, False                       # full-extent row block (always legal)
    for tr in range(1024, 127, -8):              # largest multiple-of-8 divisor
        if R % tr == 0:
            return tr, R // tr, False
    tr = 512                                     # ragged tail block, masked in-kernel
    return tr, _cdiv(R, tr), True


def _pick_w_tile(W, TR, max_block_bytes, prefer_multi):
    """(TW, nwb, col_ragged). Keeps the f32 logits block under max_block_bytes,
    keeps TW a 128-multiple whenever W is split, and never pads W in HBM."""
    budget_tw = max(128, (max_block_bytes // (4 * TR)) // 128 * 128)

    if W < 256:                                  # too narrow to split usefully
        return W, 1, False
    if not prefer_multi and W * TR * 4 <= max_block_bytes:
        return W, 1, False                       # single-TC part: one big block

    divisors = []
    if W % 128 == 0:
        divisors = [c for c in range(128, min(W, budget_tw) + 1, 128) if W % c == 0]

    if prefer_multi:
        even = [c for c in divisors if (W // c) >= 2 and (W // c) % 2 == 0]
        if even:                                 # even #blocks -> balanced 2 TCs
            tw = max(even)
            return tw, W // tw, False
    elif divisors:
        tw = max(divisors)
        return tw, W // tw, False

    # Ragged split: ceil-div blocks of 128-multiple width; tail lanes masked.
    n = max(2 if prefer_multi else 1, _cdiv(W * TR * 4, max_block_bytes))
    if prefer_multi and n % 2:
        n += 1
    tw = min(budget_tw, _round_up(_cdiv(W, n), 128), max(128, (W // 128) * 128))
    nwb = _cdiv(W, tw)
    return tw, nwb, (nwb * tw != W)


def _dice_metric_kernel(x_ref, t_ref, acc_ref, *, thres_logit, rows, cols,
                        nrb, nwb, row_ragged, col_ragged):
    wi = pl.program_id(0)            # W axis      ("parallel")
    ri = pl.program_id(1)            # row axis    = reduction ("arbitrary")

    @pl.when(ri == 0)
    def _init():
        acc_ref[...] = jnp.zeros(acc_ref.shape, acc_ref.dtype)

    x = x_ref[...]                                # (TR, TW) logits
    t = t_ref[...].astype(jnp.float32)            # (TR, TW) labels in {0, 1}
    tr, tw = x.shape
    pos = x > thres_logit                         # == sigmoid(x) > thres

    def fold8(a):
        # (TR, TW) -> (8, TW) per-sublane partial: keeps native (8, 128) tiles,
        # so the axis-0 sum is pure vreg adds (VALU only, no XLU reduce).
        if tr % 8 == 0:
            return jnp.sum(a.reshape(tr // 8, 8, tw), axis=0)
        pad = (-tr) % 8                           # tiny full-extent blocks only
        a = jnp.concatenate([a, jnp.zeros((pad, tw), a.dtype)], axis=0)
        return jnp.sum(a.reshape(-1, 8, tw), axis=0)

    def full_cnt8():
        if tr % 8 == 0:
            return jnp.full((8, tw), float(tr // 8), jnp.float32)
        return fold8(jnp.ones((tr, tw), jnp.float32))

    def accumulate(pos_m, t_m, cnt8):
        acc_ref[0] += fold8(jnp.where(pos_m, t_m, 0.0))     # sum(pos * t)
        acc_ref[1] += fold8(jnp.where(pos_m, 1.0, 0.0))     # sum(pos)
        acc_ref[2] += fold8(t_m)                            # sum(t)
        acc_ref[3] += cnt8                                   # count(valid)

    if not (row_ragged or col_ragged):
        accumulate(pos, t, full_cnt8())
        return

    # Ragged tails: only the last row / W block(s) pay for the mask.
    conds = []
    if row_ragged:
        conds.append(ri == nrb - 1)
    if col_ragged:
        conds.append(wi == nwb - 1)
    need_mask = conds[0]
    for c in conds[1:]:
        need_mask = jnp.logical_or(need_mask, c)

    @pl.when(jnp.logical_not(need_mask))
    def _interior():
        accumulate(pos, t, full_cnt8())

    @pl.when(need_mask)
    def _tail():
        valid = None
        if row_ragged:
            r_idx = ri * tr + lax.broadcasted_iota(jnp.int32, (tr, tw), 0)
            valid = r_idx < rows
        if col_ragged:
            c_idx = wi * tw + lax.broadcasted_iota(jnp.int32, (tr, tw), 1)
            cmask = c_idx < cols
            valid = cmask if valid is None else jnp.logical_and(valid, cmask)
        accumulate(jnp.logical_and(pos, valid),
                   jnp.where(valid, t, 0.0),
                   fold8(valid.astype(jnp.float32)))


def dice_metric_pallas(logits, target, eps=0.5, thres=0.5):
    """Equivalent of DiceMetric().forward(logits, target) for logits [B, 1, H, W]
    float and target [B, 1, H, W] (or [B, H, W]) integer labels in {0, 1}
    (streamed in its native dtype; no wrapper-side casts or padding)."""
    B, C, H, W = logits.shape
    assert C == 1, "Pallas kernel implements the num_classes == 1 branch"
    # TODO(synk): num_classes > 1 (softmax over channels) branch not implemented.

    if target.ndim == 4:
        target = target[:, 0]
    R = B * H
    x = logits[:, 0, :, :].reshape(R, W)
    t = target.reshape(R, W)

    # ---- generation-aware tiling budget --------------------------------------
    phys_vmem = _tpu_vmem_bytes()
    if phys_vmem <= (64 << 20):          # v7x-class: 64 MiB VMEM, 2 TensorCores
        max_block_bytes, vmem_limit, prefer_multi = 4 << 20, 48 << 20, True
    else:                                # v5e / v6e: 128 MiB VMEM, 1 TensorCore
        max_block_bytes, vmem_limit, prefer_multi = 8 << 20, 96 << 20, False

    TR, nrb, row_ragged = _pick_row_tile(R)
    TW, nwb, col_ragged = _pick_w_tile(W, TR, max_block_bytes, prefer_multi)
    W_out = nwb * TW

    thres_logit = float(math.log(thres) - math.log1p(-thres))   # 0.0 for thres=0.5
    kernel = functools.partial(
        _dice_metric_kernel, thres_logit=thres_logit, rows=R, cols=W,
        nrb=nrb, nwb=nwb, row_ragged=row_ragged, col_ragged=col_ragged)

    # Small blocks do not amortize DMA latency at depth 2 -> request a 3rd buffer.
    deep_pipe = (TR * TW * 4 <= (1 << 20)) and (nrb * nwb >= 4)

    def in_spec():
        if deep_pipe:
            try:
                return pl.BlockSpec((TR, TW), lambda wi, ri: (ri, wi),
                                    pipeline_mode=pl.Buffered(3))
            except TypeError:            # older jax without pipeline_mode
                pass
        return pl.BlockSpec((TR, TW), lambda wi, ri: (ri, wi))

    bytes_accessed = int(R * W * (4 + t.dtype.itemsize) + 4 * 8 * W_out * 4)
    acc = pl.pallas_call(
        kernel,
        out_shape=jax.ShapeDtypeStruct((4, 8, W_out), jnp.float32),
        grid_spec=pltpu.PrefetchScalarGridSpec(
            num_scalar_prefetch=0,
            grid=(nwb, nrb),                      # (parallel W, reduction rows)
            in_specs=[in_spec(), in_spec()],
            out_specs=pl.BlockSpec((4, 8, TW), lambda wi, ri: (0, 0, wi)),
        ),
        compiler_params=pltpu.CompilerParams(
            dimension_semantics=("parallel", "arbitrary"),
            vmem_limit_bytes=vmem_limit),
        cost_estimate=pl.CostEstimate(
            flops=8 * R * W, transcendentals=0, bytes_accessed=bytes_accessed),
    )(x, t)

    # ---- finalize (tiny glue) -------------------------------------------------
    spt, sp, st, cnt = acc[0], acc[1], acc[2], acc[3]       # (8, W_out) partials
    inter0 = jnp.sum(spt)                                   # sum(pos * t)
    card0 = jnp.sum(sp + st)                                # sum(pos) + sum(t)
    # Neg channel derived per (sublane, lane) entry (small, exact-in-f32 counts)
    # BEFORE the global sum, so there is no large-N cancellation.
    inter1 = jnp.sum(cnt - sp - st + spt)                   # sum((1-pos)*(1-t))
    card1 = jnp.sum(2.0 * cnt - sp - st)                    # sum((1-pos)+(1-t))
    dice = 0.5 * (2.0 * inter0 / (card0 + eps) + 2.0 * inter1 / (card1 + eps))
    return 1.0 - dice


def _reference(logits, target, eps=0.5, thres=0.5):
    """Pure-JAX transcription of the PyTorch dice_metric (num_classes == 1 path)
    as invoked by DiceMetric.forward: dice_metric(target, logits, 0.5)."""
    tsq = target[:, 0].astype(jnp.float32)                      # [B, H, W]
    true_1_hot = jnp.stack([tsq, 1.0 - tsq], axis=1)            # cat([s, f]) order
    pos = (jax.nn.sigmoid(logits) > thres).astype(jnp.float32)  # [B, 1, H, W]
    probas = jnp.concatenate([pos, 1.0 - pos], axis=1)          # [B, 2, H, W]
    dims = (0, 2, 3)                                            # true is 4-D
    inter = jnp.sum(probas * true_1_hot, axis=dims)
    card = jnp.sum(probas + true_1_hot, axis=dims)
    dice = jnp.mean(2.0 * inter / (card + eps))
    return 1.0 - dice


if __name__ == "__main__":
    key = jax.random.PRNGKey(0)
    k1, k2 = jax.random.split(key)
    B, H, W = 2, 16, 16
    logits = jax.random.normal(k1, (B, 1, H, W), dtype=jnp.float32)
    # int8 labels in HBM (target stream is 1/4 the bytes of int32; kernel is HBM-bound)
    target = (jax.random.uniform(k2, (B, 1, H, W)) > 0.5).astype(jnp.int8)

    out = dice_metric_pallas(logits, target)
    out = jax.block_until_ready(out)

    ref = _reference(logits, target)
    assert jnp.allclose(out, ref, atol=1e-5, rtol=1e-5), (out, ref)

    print("KERNEL_OK")
</pallas_src>

<mosaic_0001>
module attributes {stable_mosaic.version = 11 : i64} {
  func.func @_dice_metric_kernel(%arg0: i32, %arg1: i32, %arg2: memref<32x16xf32, #tpu.memory_space<vmem>>, %arg3: memref<32x16xi8, #tpu.memory_space<vmem>>, %arg4: memref<4x8x16xf32, #tpu.memory_space<vmem>>) attributes {dimension_semantics = [#tpu.dimension_semantics<parallel>, #tpu.dimension_semantics<arbitrary>], iteration_bounds = array<i64: 1, 1>, scalar_prefetch = 0 : i64, scratch_operands = 0 : i64, tpu.core_type = #tpu.core_type<tc>, window_params = [{transform_indices = @transform_0, window_bounds = array<i64: 32, 16>}, {transform_indices = @transform_1, window_bounds = array<i64: 32, 16>}, {transform_indices = @transform_2, window_bounds = array<i64: 4, 8, 16>}]} {
    %c0_i32 = arith.constant 0 : i32
    %0 = arith.cmpi eq, %arg1, %c0_i32 : i32
    %1 = arith.extui %0 : i1 to i32
    %c0_i32_0 = arith.constant 0 : i32
    %2 = arith.cmpi ne, %1, %c0_i32_0 : i32
    scf.if %2 {
      %cst_32 = arith.constant 0.000000e+00 : f32
      %44 = vector.broadcast %cst_32 : f32 to vector<4x8x16xf32>
      %c0_33 = arith.constant 0 : index
      %c0_34 = arith.constant 0 : index
      %c0_35 = arith.constant 0 : index
      %45 = vector.load %arg4[%c0_33, %c0_34, %c0_35] : memref<4x8x16xf32, #tpu.memory_space<vmem>>, vector<4x8x16xf32>
      tpu.vector_store %arg4[%c0_33, %c0_34, %c0_35], %44 {strides = array<i32>} : memref<4x8x16xf32, #tpu.memory_space<vmem>>, vector<4x8x16xf32>,
    } else {
    }
    %c0 = arith.constant 0 : index
    %c0_1 = arith.constant 0 : index
    %3 = vector.load %arg2[%c0, %c0_1] : memref<32x16xf32, #tpu.memory_space<vmem>>, vector<32x16xf32>
    %c0_2 = arith.constant 0 : index
    %c0_3 = arith.constant 0 : index
    %4 = vector.load %arg3[%c0_2, %c0_3] : memref<32x16xi8, #tpu.memory_space<vmem>>, vector<32x16xi8>
    %5 = arith.sitofp %4 : vector<32x16xi8> to vector<32x16xf32>
    %cst = arith.constant 0.000000e+00 : f32
    %6 = vector.broadcast %cst : f32 to vector<32x16xf32>
    %7 = arith.cmpf ogt, %3, %6 : vector<32x16xf32>
    %cst_4 = arith.constant 4.000000e+00 : f32
    %8 = vector.broadcast %cst_4 : f32 to vector<8x16xf32>
    %c0_5 = arith.constant 0 : index
    %c0_6 = arith.constant 0 : index
    %c0_7 = arith.constant 0 : index
    %9 = vector.load %arg4[%c0_5, %c0_6, %c0_7] : memref<4x8x16xf32, #tpu.memory_space<vmem>>, vector<1x8x16xf32>
    %10 = vector.shape_cast %9 : vector<1x8x16xf32> to vector<8x16xf32>
    %cst_8 = arith.constant 0.000000e+00 : f32
    %11 = vector.broadcast %cst_8 : f32 to vector<32x16xf32>
    %12 = arith.select %7, %5, %11 : vector<32x16xi1>, vector<32x16xf32>
    %13 = vector.shape_cast %12 : vector<32x16xf32> to vector<4x8x16xf32>
    %cst_9 = arith.constant dense<0.000000e+00> : vector<8x16xf32>
    %14 = vector.multi_reduction <add>, %13, %cst_9 [0] : vector<4x8x16xf32> to vector<8x16xf32>
    %15 = arith.addf %10, %14 : vector<8x16xf32>
    %c0_10 = arith.constant 0 : index
    %c0_11 = arith.constant 0 : index
    %c0_12 = arith.constant 0 : index
    %16 = vector.load %arg4[%c0_10, %c0_11, %c0_12] : memref<4x8x16xf32, #tpu.memory_space<vmem>>, vector<1x8x16xf32>
    %17 = vector.shape_cast %16 : vector<1x8x16xf32> to vector<8x16xf32>
    %18 = vector.shape_cast %15 : vector<8x16xf32> to vector<1x8x16xf32>
    tpu.vector_store %arg4[%c0_10, %c0_11, %c0_12], %18 {strides = array<i32>} : memref<4x8x16xf32, #tpu.memory_space<vmem>>, vector<1x8x16xf32>,
    %c1 = arith.constant 1 : index
    %c0_13 = arith.constant 0 : index
    %c0_14 = arith.constant 0 : index
    %19 = vector.load %arg4[%c1, %c0_13, %c0_14] : memref<4x8x16xf32, #tpu.memory_space<vmem>>, vector<1x8x16xf32>
    %20 = vector.shape_cast %19 : vector<1x8x16xf32> to vector<8x16xf32>
    %cst_15 = arith.constant 1.000000e+00 : f32
    %cst_16 = arith.constant 0.000000e+00 : f32
    %21 = vector.broadcast %cst_15 : f32 to vector<32x16xf32>
    %22 = vector.broadcast %cst_16 : f32 to vector<32x16xf32>
    %23 = arith.select %7, %21, %22 : vector<32x16xi1>, vector<32x16xf32>
    %24 = vector.shape_cast %23 : vector<32x16xf32> to vector<4x8x16xf32>
    %cst_17 = arith.constant dense<0.000000e+00> : vector<8x16xf32>
    %25 = vector.multi_reduction <add>, %24, %cst_17 [0] : vector<4x8x16xf32> to vector<8x16xf32>
    %26 = arith.addf %20, %25 : vector<8x16xf32>
    %c1_18 = arith.constant 1 : index
    %c0_19 = arith.constant 0 : index
    %c0_20 = arith.constant 0 : index
    %27 = vector.load %arg4[%c1_18, %c0_19, %c0_20] : memref<4x8x16xf32, #tpu.memory_space<vmem>>, vector<1x8x16xf32>
    %28 = vector.shape_cast %27 : vector<1x8x16xf32> to vector<8x16xf32>
    %29 = vector.shape_cast %26 : vector<8x16xf32> to vector<1x8x16xf32>
    tpu.vector_store %arg4[%c1_18, %c0_19, %c0_20], %29 {strides = array<i32>} : memref<4x8x16xf32, #tpu.memory_space<vmem>>, vector<1x8x16xf32>,
    %c2 = arith.constant 2 : index
    %c0_21 = arith.constant 0 : index
    %c0_22 = arith.constant 0 : index
    %30 = vector.load %arg4[%c2, %c0_21, %c0_22] : memref<4x8x16xf32, #tpu.memory_space<vmem>>, vector<1x8x16xf32>
    %31 = vector.shape_cast %30 : vector<1x8x16xf32> to vector<8x16xf32>
    %32 = vector.shape_cast %5 : vector<32x16xf32> to vector<4x8x16xf32>
    %cst_23 = arith.constant dense<0.000000e+00> : vector<8x16xf32>
    %33 = vector.multi_reduction <add>, %32, %cst_23 [0] : vector<4x8x16xf32> to vector<8x16xf32>
    %34 = arith.addf %31, %33 : vector<8x16xf32>
    %c2_24 = arith.constant 2 : index
    %c0_25 = arith.constant 0 : index
    %c0_26 = arith.constant 0 : index
    %35 = vector.load %arg4[%c2_24, %c0_25, %c0_26] : memref<4x8x16xf32, #tpu.memory_space<vmem>>, vector<1x8x16xf32>
    %36 = vector.shape_cast %35 : vector<1x8x16xf32> to vector<8x16xf32>
    %37 = vector.shape_cast %34 : vector<8x16xf32> to vector<1x8x16xf32>
    tpu.vector_store %arg4[%c2_24, %c0_25, %c0_26], %37 {strides = array<i32>} : memref<4x8x16xf32, #tpu.memory_space<vmem>>, vector<1x8x16xf32>,
    %c3 = arith.constant 3 : index
    %c0_27 = arith.constant 0 : index
    %c0_28 = arith.constant 0 : index
    %38 = vector.load %arg4[%c3, %c0_27, %c0_28] : memref<4x8x16xf32, #tpu.memory_space<vmem>>, vector<1x8x16xf32>
    %39 = vector.shape_cast %38 : vector<1x8x16xf32> to vector<8x16xf32>
    %40 = arith.addf %39, %8 : vector<8x16xf32>
    %c3_29 = arith.constant 3 : index
    %c0_30 = arith.constant 0 : index
    %c0_31 = arith.constant 0 : index
    %41 = vector.load %arg4[%c3_29, %c0_30, %c0_31] : memref<4x8x16xf32, #tpu.memory_space<vmem>>, vector<1x8x16xf32>
    %42 = vector.shape_cast %41 : vector<1x8x16xf32> to vector<8x16xf32>
    %43 = vector.shape_cast %40 : vector<8x16xf32> to vector<1x8x16xf32>
    tpu.vector_store %arg4[%c3_29, %c0_30, %c0_31], %43 {strides = array<i32>} : memref<4x8x16xf32, #tpu.memory_space<vmem>>, vector<1x8x16xf32>,
    return
  }
  func.func @transform_0(%arg0: i32, %arg1: i32) -> (i32, i32) {
    %c0_i32 = arith.constant 0 : i32
    return %arg1, %arg0 : i32, i32
  }
  func.func @transform_1(%arg0: i32, %arg1: i32) -> (i32, i32) {
    %c0_i32 = arith.constant 0 : i32
    return %arg1, %arg0 : i32, i32
  }
  func.func @transform_2(%arg0: i32, %arg1: i32) -> (i32, i32, i32) {
    %c0_i32 = arith.constant 0 : i32
    %c0_i32_0 = arith.constant 0 : i32
    %c0_i32_1 = arith.constant 0 : i32
    return %c0_i32, %c0_i32_0, %arg0 : i32, i32, i32
  }
}

</mosaic_0001>

<bundles_post_ra>
// kernel: tpu_custom_call.1
= control target key start
LH: loop header
LB: loop body
LE: loop exit
PB: predicated region body
PF: predicated region fallthrough
CT: control target
= control target key end

     0   :  { %vm16_vm0 = vcmask 130048   ;;  %v131_v3 = vmov 0.0   ;;  %s194_s0 = inlined_call_operand.vmem [shape: f32[32,16], index: 0, kind: input, shape index: {}]   ;;  %s195_s1 = inlined_call_operand.vmem [shape: s8[32,16], index: 1, kind: input, shape index: {}]   ;;  %s196_s2 = inlined_call_operand.hbm [shape: f32[4,8,16], index: 2, kind: output, shape index: {}]  }
   0x1   :  { %v21_v0 = vld [vmem:[%s194_s0] sm:$0xff]  ;;  %v22_v1 = vld [vmem:[%s194_s0 + $0x8] sm:$0xff]  ;;  %v23_v2 = vld [vmem:[%s194_s0 + $0x10] sm:$0xff]  ;;  %17 = vst.msk [vmem:[#allocation2] sm:$0xff] %vm16_vm0, %v131_v3 }
   0x2   :  { %v24_v4 = vld [vmem:[%s194_s0 + $0x18] sm:$0xff]  ;;  %v25_v5 = vld [vmem:[%s195_s1] sm:$0xff]  ;;  %vm34_vm1 = vcmp.gt.f32.partialorder %v21_v0, 0.0  ;;  %vm35_vm2 = vcmp.gt.f32.partialorder %v22_v1, 0.0  ;;  %vm36_vm3 = vcmp.gt.f32.partialorder %v23_v2, 0.0  ;;  %18 = vst.msk [vmem:[#allocation2 + $0x8] sm:$0xff] %vm16_vm0, %v131_v3 }
   0x3   :  { %v26_v6 = vunpack.c.0.s8 %v25_v5  ;;  %v27_v7 = vunpack.c.1.s8 %v25_v5  ;;  %v28_v8 = vunpack.c.2.s8 %v25_v5  ;;  %v29_v9 = vunpack.c.3.s8 %v25_v5 }
   0x4   :  { %7 = vsyncpa [#allocation3], 0  ;;  %19 = vst.msk [vmem:[#allocation2 + $0x10] sm:$0xff] %vm16_vm0, %v131_v3  ;;  %vm37_vm4 = vcmp.gt.f32.partialorder %v24_v4, 0.0  ;;  %v55_v10 = vsel %vm34_vm1, 1.0, %v131_v3  ;;  %v56_v11 = vsel %vm35_vm2, 1.0, %v131_v3 }
   0x5   :  { %v57_v12 = vsel %vm36_vm3, 1.0, %v131_v3  ;;  %20 = vst.msk [vmem:[#allocation2 + $0x18] sm:$0xff] %vm16_vm0, %v131_v3  ;;  %v30_v13 = vcvt.s32.f32 %v26_v6  ;;  %v31_v14 = vcvt.s32.f32 %v27_v7  ;;  %v32_v15 = vcvt.s32.f32 %v28_v8  ;;  %s132_s0 = smov [#allocation2]   ;;  %s89_s21 = sshll.u32 %s196_s2, 4  ;;  %s90_s21 = int_to_ptr.hbm [resolvable:$true] %s89_s21 }
   0x6   :  { %v33_v16 = vcvt.s32.f32 %v29_v9  ;;  %v58_v17 = vsel %vm37_vm4, 1.0, %v131_v3  ;;  %v59_v18 = vsel %vm16_vm0, %v55_v10, 0.0  ;;  %v60_v19 = vsel %vm16_vm0, %v56_v11, 0.0  ;;  %s87_s1 = sshll.u32 %s132_s0, 4  ;;  %s133_s22 = smov 128   ;;  %s88_s1 = int_to_ptr.vmem [resolvable:$true] %s87_s1 }
   0x7   :  { %v39_v20 = vsel %vm34_vm1, %v30_v13, 0.0  ;;  %v40_v21 = vsel %vm35_vm2, %v31_v14, 0.0  ;;  %v41_v22 = vsel %vm36_vm3, %v32_v15, 0.0  ;;  %v62_v27 = vsel %vm16_vm0, %v57_v12, 0.0  ;;  %s134_s23 = smov 8  }
   0x8   :  { %v42_v23 = vsel %vm37_vm4, %v33_v16, 0.0  ;;  %v44_v24 = vsel %vm16_vm0, %v39_v20, 0.0  ;;  %v45_v25 = vsel %vm16_vm0, %v40_v21, 0.0  ;;  %v47_v26 = vsel %vm16_vm0, %v41_v22, 0.0  ;;  %v38_v38 = vld [vmem:[#allocation2] sm:$0xff] }
   0x9   :  { %v46_v28 = vadd.f32 %v45_v25, %v44_v24  ;;  %v61_v29 = vadd.f32 %v60_v19, %v59_v18  ;;  %v70_v30 = vsel %vm16_vm0, %v30_v13, 0.0  ;;  %v49_v31 = vsel %vm16_vm0, %v42_v23, 0.0  ;;  %v54_v39 = vld [vmem:[#allocation2 + $0x8] sm:$0xff] }
   0xa   :  { %v64_v32 = vsel %vm16_vm0, %v58_v17, 0.0  ;;  %v71_v33 = vsel %vm16_vm0, %v31_v14, 0.0  ;;  %v73_v34 = vsel %vm16_vm0, %v32_v15, 0.0  ;;  %v75_v40 = vsel %vm16_vm0, %v33_v16, 0.0 }
   0xb   :  { %v48_v35 = vadd.f32 %v47_v26, %v46_v28  ;;  %v63_v36 = vadd.f32 %v62_v27, %v61_v29  ;;  %v72_v37 = vadd.f32 %v71_v33, %v70_v30  ;;  %v69_v46 = vld [vmem:[#allocation2 + $0x10] sm:$0xff] }
   0xc   :  { %v80_v41 = vld [vmem:[#allocation2 + $0x18] sm:$0xff] }
   0xd   :  { %v50_v42 = vadd.f32 %v49_v31, %v48_v35  ;;  %v65_v43 = vadd.f32 %v64_v32, %v63_v36  ;;  %v74_v44 = vadd.f32 %v73_v34, %v72_v37  ;;  %v81_v45 = vadd.f32 4.0, %v80_v41 }
   0xf   :  { %v51_v47 = vadd.f32 %v50_v42, %v38_v38  ;;  %v66_v48 = vadd.f32 %v65_v43, %v54_v39  ;;  %v76_v49 = vadd.f32 %v75_v40, %v74_v44  ;;  %82 = vst.msk [vmem:[#allocation2 + $0x18] sm:$0xff] %vm16_vm0, %v81_v45 }
  0x11   :  { %52 = vst.msk [vmem:[#allocation2] sm:$0xff] %vm16_vm0, %v51_v47  ;;  %v77_v50 = vadd.f32 %v76_v49, %v69_v46 }
  0x12   :  { %67 = vst.msk [vmem:[#allocation2 + $0x8] sm:$0xff] %vm16_vm0, %v66_v48 }
  0x13   :  { %78 = vst.msk [vmem:[#allocation2 + $0x10] sm:$0xff] %vm16_vm0, %v77_v50 }
  0x14   :  { %95 = dma.vmem_to_hbm [thread:$0]  %s88_s1, 512, %s90_s21, [#allocation3], %s133_s22, %s133_s22, %s134_s23  }
  0x15   :  { %129 = dma.done.wait [#allocation3], 512  }
  0x16   :  { %130 = vsyncadd [#allocation3], 4294966784 }
  0x17   :  { %100 = vsyncpa [#allocation3], 1 }

</bundles_post_ra>
